<compile_context>
chip_gen: v7x
topology: tpu7x:2x2x1
jax: 0.10.0
libtpu: 0.0.40
codegen_flags: <defaults>
</compile_context>

<pallas_src>
import math

import jax
import jax.numpy as jnp
from jax.experimental import pallas as pl
from jax.experimental.pallas import tpu as pltpu


_VMEM_LIMIT_BYTES = 32 * 1024 * 1024   # raise v5e's 16 MiB scoped default; <= v6e/v7x limits
_VMEM_TILE_BUDGET = 12 * 1024 * 1024   # per-step working-set target (headroom vs. the limit)


# --------------------------------------------------------------------------
# Shared math
# --------------------------------------------------------------------------
def _selu(x):
    # SELU constants identical to torch.nn.functional.selu / jax.nn.selu.
    alpha = 1.6732632423543772848170429916717
    scale = 1.0507009873554804934193349852946
    return scale * jnp.where(x > 0, x, alpha * (jnp.exp(x) - 1.0))


def _newton_reciprocal(d):
    # EUP approximate reciprocal + one Newton step -> ~f32 accuracy, no VALU divide.
    r = pl.reciprocal(d, approx=True)
    return r * (2.0 - d * r)


# --------------------------------------------------------------------------
# Lane-sparse fallback kernels (used when B is not a multiple of the pack group)
# --------------------------------------------------------------------------
def _softmax_lastdim(logits):
    m = jnp.max(logits, axis=-1, keepdims=True)
    e = jnp.exp(logits - m)
    d = jnp.sum(e, axis=-1, keepdims=True)
    return e * _newton_reciprocal(d)


def _fused_kernel(x_ref, w_ref, b_ref, o_ref):
    """activation=False: the two linears are fused host-side -> one matmul."""
    logits = (
        jnp.dot(x_ref[...], w_ref[...], preferred_element_type=jnp.float32)
        + b_ref[...]
    )
    o_ref[...] = _softmax_lastdim(logits).astype(o_ref.dtype)


def _two_layer_kernel(x_ref, w0_ref, b0_ref, w1_ref, b1_ref, o_ref):
    """activation=True: FC0 -> SELU -> FC1 -> SELU -> softmax."""
    h = (
        jnp.dot(x_ref[...], w0_ref[...], preferred_element_type=jnp.float32)
        + b0_ref[...]
    )
    h = _selu(h)
    logits = (
        jnp.dot(h, w1_ref[...], preferred_element_type=jnp.float32)
        + b1_ref[...]
    )
    logits = _selu(logits)
    o_ref[...] = _softmax_lastdim(logits).astype(o_ref.dtype)


# --------------------------------------------------------------------------
# Lane-dense (packed) kernels: x packed as (B/G, G*x_dim), block-diag weights.
# --------------------------------------------------------------------------
def _group_softmax_packed(logits, rot_ref, sum_ref):
    """Softmax over each aligned group of c_dim lanes of a lane-dense tile.

    The stabilizer is the per-group max of the bf16-rounded logits, computed
    with log2(c_dim) permutation matmuls (bf16 x {0,1}-matrix accumulated in
    f32 is exact), so every lane in a group subtracts the *same* value and the
    softmax itself is mathematically exact.  The group sum is one matmul with a
    block-diagonal ones matrix (identical columns per group -> identical sums).
    """
    m = logits.astype(jnp.bfloat16).astype(jnp.float32)
    for k in range(rot_ref.shape[0]):          # static unroll, 2 steps for c_dim=4
        shifted = jnp.dot(m.astype(jnp.bfloat16), rot_ref[k],
                          preferred_element_type=jnp.float32)
        m = jnp.maximum(m, shifted)
    # Nudge up one bf16 ulp so exp(logits - m) <= 1 despite the bf16 rounding.
    m = m + jnp.abs(m) * (2.0 ** -8) + 1e-30
    e = jnp.exp(logits - m)
    d = jnp.dot(e, sum_ref[...], preferred_element_type=jnp.float32)
    return e * _newton_reciprocal(d)


def _packed_fused_kernel(x_ref, w_ref, b_ref, rot_ref, sum_ref, o_ref):
    logits = (
        jnp.dot(x_ref[...], w_ref[...], preferred_element_type=jnp.float32)
        + b_ref[...]
    )
    o_ref[...] = _group_softmax_packed(logits, rot_ref, sum_ref).astype(o_ref.dtype)


def _packed_two_layer_kernel(x_ref, w0_ref, b0_ref, w1_ref, b1_ref,
                             rot_ref, sum_ref, o_ref):
    h = (
        jnp.dot(x_ref[...], w0_ref[...], preferred_element_type=jnp.float32)
        + b0_ref[...]
    )
    h = _selu(h)
    logits = (
        jnp.dot(h, w1_ref[...], preferred_element_type=jnp.float32)
        + b1_ref[...]
    )
    logits = _selu(logits)
    o_ref[...] = _group_softmax_packed(logits, rot_ref, sum_ref).astype(o_ref.dtype)


# --------------------------------------------------------------------------
# Host-side construction of packed operands (tiny, one-time)
# --------------------------------------------------------------------------
def _block_diag(w, reps):
    """(in, out) -> (reps*in, reps*out) with `reps` copies of w on the diagonal."""
    i, o = w.shape
    eye = jnp.eye(reps, dtype=w.dtype)
    return (eye[:, None, :, None] * w[None, :, None, :]).reshape(reps * i, reps * o)


def _group_rotation(c_dim, reps, shift, dtype):
    """Permutation P with (x @ P)[:, q] = x[:, rotate-within-group(q, shift)]."""
    width = reps * c_dim
    q = jnp.arange(width)
    src = (q // c_dim) * c_dim + (q % c_dim + shift) % c_dim
    return (jnp.arange(width)[:, None] == src[None, :]).astype(dtype)


def _group_sum(c_dim, reps, dtype):
    """Block-diagonal ones: (e @ S)[:, q] = sum of e over q's group."""
    g = jnp.arange(reps * c_dim) // c_dim
    return (g[:, None] == g[None, :]).astype(dtype)


def _batch_semantics(grid_size, core_parallel):
    """Batch axis is embarrassingly parallel; use CORE_PARALLEL on 2-TC chips (v7x)."""
    if core_parallel is None:
        n_tc = int(getattr(jax.devices()[0], "num_cores", 1) or 1)
        core_parallel = n_tc > 1 and grid_size >= n_tc and grid_size % n_tc == 0
    return (pltpu.CORE_PARALLEL,) if core_parallel else ("parallel",)


def _auto_rows(total_rows, bytes_per_row, cap):
    rows = _VMEM_TILE_BUDGET // max(int(bytes_per_row), 1)
    rows = max(8, min(rows, cap))
    if rows >= total_rows:
        return total_rows
    return max(8, (rows // 8) * 8)


# --------------------------------------------------------------------------
# Public wrapper
# --------------------------------------------------------------------------
def simnet_forward(x, w0, b0, w1, b1, *, activation=False, block_b=None,
                   core_parallel=None):
    """SimNet forward.  Weights are (in, out); biases (1, out); output f32 (B, c_dim)."""
    B, x_dim = x.shape
    h_dim = w0.shape[1]
    c_dim = w1.shape[1]

    if x.dtype != jnp.float32:
        x = x.astype(jnp.float32)
    w0 = w0.astype(jnp.float32)
    w1 = w1.astype(jnp.float32)
    b0 = b0.astype(jnp.float32).reshape(1, h_dim)
    b1 = b1.astype(jnp.float32).reshape(1, c_dim)

    # Packing group: smallest G with G*x_dim and G*c_dim both multiples of 128.
    lane = 128
    gx = lane // math.gcd(lane, x_dim)
    gc = lane // math.gcd(lane, c_dim)
    group = gx * gc // math.gcd(gx, gc)
    packed = (group <= 128) and (B > 0) and (B % group == 0)

    if packed:
        bp = B // group
        wx, wh, wc = group * x_dim, group * h_dim, group * c_dim
        n_rot = max(1, (c_dim - 1).bit_length())
        rot = jnp.stack([_group_rotation(c_dim, group, 1 << k, jnp.bfloat16)
                         for k in range(n_rot)])
        ssum = _group_sum(c_dim, group, jnp.float32)
        x_p = x.reshape(bp, wx)                       # free row-major reshape

        if block_b is None:
            # Double-buffered in/out tiles + f32 temporaries (+ hidden for SELU path).
            row_bytes = 8 * (wx + wc) + 12 * wc + (8 * wh if activation else 0)
            tbp = _auto_rows(bp, row_bytes, cap=8192)
        else:
            tbp = max(1, min(bp, int(block_b) // group))
            if tbp < bp:
                tbp = max(8, (tbp // 8) * 8)
        grid = (pl.cdiv(bp, tbp),)
        compiler_params = pltpu.CompilerParams(
            dimension_semantics=_batch_semantics(grid[0], core_parallel),
            vmem_limit_bytes=_VMEM_LIMIT_BYTES,
        )

        x_spec = pl.BlockSpec((tbp, wx), lambda i: (i, 0))
        out_spec = pl.BlockSpec((tbp, wc), lambda i: (i, 0))
        out_shape = jax.ShapeDtypeStruct((bp, wc), jnp.float32)

        def const2(arr):
            return pl.BlockSpec(arr.shape, lambda i: (0, 0))

        rot_spec = pl.BlockSpec(rot.shape, lambda i: (0, 0, 0))

        if not activation:
            # (x@w0 + b0)@w1 + b1 == x@(w0@w1) + (b0@w1 + b1)  (no SELU in between)
            w_f = _block_diag(w0 @ w1, group)                  # (wx, wc)
            b_f = jnp.tile(b0 @ w1 + b1, (1, group))           # (1, wc)
            out_p = pl.pallas_call(
                _packed_fused_kernel,
                out_shape=out_shape,
                grid=grid,
                in_specs=[x_spec, const2(w_f), const2(b_f), rot_spec, const2(ssum)],
                out_specs=out_spec,
                compiler_params=compiler_params,
            )(x_p, w_f, b_f, rot, ssum)
        else:
            w0_b = _block_diag(w0, group)                      # (wx, wh)
            w1_b = _block_diag(w1, group)                      # (wh, wc)
            b0_b = jnp.tile(b0, (1, group))                    # (1, wh)
            b1_b = jnp.tile(b1, (1, group))                    # (1, wc)
            out_p = pl.pallas_call(
                _packed_two_layer_kernel,
                out_shape=out_shape,
                grid=grid,
                in_specs=[x_spec, const2(w0_b), const2(b0_b), const2(w1_b),
                          const2(b1_b), rot_spec, const2(ssum)],
                out_specs=out_spec,
                compiler_params=compiler_params,
            )(x_p, w0_b, b0_b, w1_b, b1_b, rot, ssum)
        return out_p.reshape(B, c_dim)                         # free reshape

    # ---------------- lane-sparse fallback (B not a multiple of the group) -------
    tb = min(B, 8192) if block_b is None else min(B, int(block_b))
    if tb < B:
        tb = max(8, (tb // 8) * 8)
    grid = (pl.cdiv(B, tb),)
    compiler_params = pltpu.CompilerParams(
        dimension_semantics=_batch_semantics(grid[0], core_parallel),
        vmem_limit_bytes=_VMEM_LIMIT_BYTES,
    )
    x_spec = pl.BlockSpec((tb, x_dim), lambda i: (i, 0))
    out_spec = pl.BlockSpec((tb, c_dim), lambda i: (i, 0))
    out_shape = jax.ShapeDtypeStruct((B, c_dim), jnp.float32)

    if not activation:
        w_f = w0 @ w1
        b_f = b0 @ w1 + b1
        return pl.pallas_call(
            _fused_kernel,
            out_shape=out_shape,
            grid=grid,
            in_specs=[x_spec,
                      pl.BlockSpec(w_f.shape, lambda i: (0, 0)),
                      pl.BlockSpec(b_f.shape, lambda i: (0, 0))],
            out_specs=out_spec,
            compiler_params=compiler_params,
        )(x, w_f, b_f)

    return pl.pallas_call(
        _two_layer_kernel,
        out_shape=out_shape,
        grid=grid,
        in_specs=[x_spec,
                  pl.BlockSpec(w0.shape, lambda i: (0, 0)),
                  pl.BlockSpec(b0.shape, lambda i: (0, 0)),
                  pl.BlockSpec(w1.shape, lambda i: (0, 0)),
                  pl.BlockSpec(b1.shape, lambda i: (0, 0))],
        out_specs=out_spec,
        compiler_params=compiler_params,
    )(x, w0, b0, w1, b1)


def init_simnet_params(key, x_dim=4, h_dim=16, c_dim=4):
    """Deterministic init mimicking PyTorch Linear default U(-1/sqrt(fan_in), +)."""
    k0, k1, k2, k3 = jax.random.split(key, 4)
    bound0 = 1.0 / jnp.sqrt(x_dim)
    bound1 = 1.0 / jnp.sqrt(h_dim)
    w0 = jax.random.uniform(k0, (x_dim, h_dim), jnp.float32, -bound0, bound0)
    b0 = jax.random.uniform(k1, (1, h_dim), jnp.float32, -bound0, bound0)
    w1 = jax.random.uniform(k2, (h_dim, c_dim), jnp.float32, -bound1, bound1)
    b1 = jax.random.uniform(k3, (1, c_dim), jnp.float32, -bound1, bound1)
    return w0, b0, w1, b1


if __name__ == "__main__":
    key = jax.random.PRNGKey(0)
    kx1, kx2, kx3, kx4, kp = jax.random.split(key, 5)

    x_dim, h_dim, c_dim = 4, 16, 4
    w0, b0, w1, b1 = init_simnet_params(kp, x_dim=x_dim, h_dim=h_dim, c_dim=c_dim)

    def ref_fwd(x, activation):
        h = x @ w0 + b0
        if activation:
            h = jax.nn.selu(h)
        z = h @ w1 + b1
        if activation:
            z = jax.nn.selu(z)
        return jax.nn.softmax(z, axis=1)

    # --- 1) tiny batch (B=8, not a multiple of 32) -> lane-sparse fallback path ---
    x_small = jax.random.normal(kx1, (8, x_dim), jnp.float32)
    for act in (False, True):
        out = jax.block_until_ready(
            simnet_forward(x_small, w0, b0, w1, b1, activation=act))
        ref = ref_fwd(x_small, act)
        assert out.shape == (8, c_dim)
        assert jnp.allclose(out, ref, atol=1e-5, rtol=1e-5)
        assert jnp.allclose(jnp.sum(out, axis=1), 1.0, atol=1e-5)

    # --- 2) lane-dense packed path, single tile (B=64 is a multiple of G=32) ---
    x_med = jax.random.normal(kx2, (64, x_dim), jnp.float32)
    for act in (False, True):
        out = jax.block_until_ready(
            simnet_forward(x_med, w0, b0, w1, b1, activation=act))
        ref = ref_fwd(x_med, act)
        assert out.shape == (64, c_dim)
        assert jnp.allclose(out, ref, atol=1e-4, rtol=1e-4)
        assert jnp.allclose(jnp.sum(out, axis=1), 1.0, atol=1e-4)

    # --- 3) packed path, multiple grid steps with a remainder tile ---
    #     B=4128 -> 129 packed rows; block_b=2048 -> 64 packed rows/step, 3 steps.
    x_big = jax.random.normal(kx3, (4128, x_dim), jnp.float32)
    out = jax.block_until_ready(
        simnet_forward(x_big, w0, b0, w1, b1, activation=False, block_b=2048))
    ref = ref_fwd(x_big, False)
    assert out.shape == (4128, c_dim)
    assert jnp.allclose(out, ref, atol=1e-4, rtol=1e-4)
    assert jnp.allclose(jnp.sum(out, axis=1), 1.0, atol=1e-4)

    # --- 4) fallback path with a remainder tile (B=1000, block_b=256 -> 4 steps) ---
    x_odd = jax.random.normal(kx4, (1000, x_dim), jnp.float32)
    out = jax.block_until_ready(
        simnet_forward(x_odd, w0, b0, w1, b1, activation=True, block_b=256))
    ref = ref_fwd(x_odd, True)
    assert out.shape == (1000, c_dim)
    assert jnp.allclose(out, ref, atol=1e-5, rtol=1e-5)
    assert jnp.allclose(jnp.sum(out, axis=1), 1.0, atol=1e-5)

    print("KERNEL_OK")
</pallas_src>

<mosaic_0001>
module attributes {stable_mosaic.version = 11 : i64} {
  func.func @_fused_kernel(%arg0: i32, %arg1: memref<8x4xf32, #tpu.memory_space<vmem>>, %arg2: memref<4x4xf32, #tpu.memory_space<vmem>>, %arg3: memref<1x4xf32, #tpu.memory_space<vmem>>, %arg4: memref<8x4xf32, #tpu.memory_space<vmem>>) attributes {dimension_semantics = [#tpu.dimension_semantics<parallel>], iteration_bounds = array<i64: 1>, scalar_prefetch = 0 : i64, scratch_operands = 0 : i64, tpu.core_type = #tpu.core_type<tc>, window_params = [{transform_indices = @transform_0, window_bounds = array<i64: 8, 4>}, {pipeline_mode = #tpu.pipeline_mode<synchronous>, transform_indices = @transform_1, window_bounds = array<i64: 4, 4>}, {pipeline_mode = #tpu.pipeline_mode<synchronous>, transform_indices = @transform_2, window_bounds = array<i64: 1, 4>}, {transform_indices = @transform_3, window_bounds = array<i64: 8, 4>}]} {
    %c0 = arith.constant 0 : index
    %c0_0 = arith.constant 0 : index
    %0 = vector.load %arg1[%c0, %c0_0] : memref<8x4xf32, #tpu.memory_space<vmem>>, vector<8x4xf32>
    %c0_1 = arith.constant 0 : index
    %c0_2 = arith.constant 0 : index
    %1 = vector.load %arg2[%c0_1, %c0_2] : memref<4x4xf32, #tpu.memory_space<vmem>>, vector<4x4xf32>
    %cst = arith.constant dense<0.000000e+00> : vector<8x4xf32>
    %2 = tpu.matmul %0, %1, %cst {dimension_numbers = #tpu.dot_dimension_numbers<[1], [0], [0], [1], [0, 0, 1, 1], [], []>} : vector<8x4xf32>, vector<4x4xf32>, vector<8x4xf32> -> vector<8x4xf32>
    %c0_3 = arith.constant 0 : index
    %c0_4 = arith.constant 0 : index
    %3 = vector.load %arg3[%c0_3, %c0_4] : memref<1x4xf32, #tpu.memory_space<vmem>>, vector<1x4xf32>
    %4 = vector.broadcast %3 : vector<1x4xf32> to vector<8x4xf32>
    %5 = arith.addf %2, %4 : vector<8x4xf32>
    %cst_5 = arith.constant dense<0xFF800000> : vector<8xf32>
    %6 = vector.multi_reduction <maximumf>, %5, %cst_5 [1] : vector<8x4xf32> to vector<8xf32>
    %7 = vector.shape_cast %6 : vector<8xf32> to vector<8x1xf32>
    %8 = vector.broadcast %7 : vector<8x1xf32> to vector<8x4xf32>
    %9 = arith.subf %5, %8 : vector<8x4xf32>
    %10 = math.exp %9 : vector<8x4xf32>
    %cst_6 = arith.constant dense<0.000000e+00> : vector<8xf32>
    %11 = vector.multi_reduction <add>, %10, %cst_6 [1] : vector<8x4xf32> to vector<8xf32>
    %12 = vector.shape_cast %11 : vector<8xf32> to vector<8x1xf32>
    %13 = tpu.reciprocal %12 {approx = true} : vector<8x1xf32> -> vector<8x1xf32>
    %14 = arith.mulf %12, %13 : vector<8x1xf32>
    %cst_7 = arith.constant 2.000000e+00 : f32
    %15 = vector.broadcast %cst_7 : f32 to vector<8x1xf32>
    %16 = arith.subf %15, %14 : vector<8x1xf32>
    %17 = arith.mulf %13, %16 : vector<8x1xf32>
    %18 = vector.broadcast %17 : vector<8x1xf32> to vector<8x4xf32>
    %19 = arith.mulf %10, %18 : vector<8x4xf32>
    %c0_8 = arith.constant 0 : index
    %c0_9 = arith.constant 0 : index
    %20 = vector.load %arg4[%c0_8, %c0_9] : memref<8x4xf32, #tpu.memory_space<vmem>>, vector<8x4xf32>
    tpu.vector_store %arg4[%c0_8, %c0_9], %19 {strides = array<i32>} : memref<8x4xf32, #tpu.memory_space<vmem>>, vector<8x4xf32>,
    return
  }
  func.func @transform_0(%arg0: i32) -> (i32, i32) {
    %c0_i32 = arith.constant 0 : i32
    %c0_i32_0 = arith.constant 0 : i32
    return %arg0, %c0_i32 : i32, i32
  }
  func.func @transform_1(%arg0: i32) -> (i32, i32) {
    %c0_i32 = arith.constant 0 : i32
    %c0_i32_0 = arith.constant 0 : i32
    %c0_i32_1 = arith.constant 0 : i32
    return %c0_i32, %c0_i32_0 : i32, i32
  }
  func.func @transform_2(%arg0: i32) -> (i32, i32) {
    %c0_i32 = arith.constant 0 : i32
    %c0_i32_0 = arith.constant 0 : i32
    %c0_i32_1 = arith.constant 0 : i32
    return %c0_i32, %c0_i32_0 : i32, i32
  }
  func.func @transform_3(%arg0: i32) -> (i32, i32) {
    %c0_i32 = arith.constant 0 : i32
    %c0_i32_0 = arith.constant 0 : i32
    return %arg0, %c0_i32 : i32, i32
  }
}

</mosaic_0001>

<bundles_post_ra>
// kernel: tpu_custom_call.1
= control target key start
LH: loop header
LB: loop body
LE: loop exit
PB: predicated region body
PF: predicated region fallthrough
CT: control target
= control target key end

     0   :  { %vm27_vm0 = vcmask 1043456   ;;  %vm23_vm1 = vcmask 31744   ;;  %v136_v0 = vmov 0.0   ;;  %vm137_vm2 = vmmov 0   ;;  %s174_s1 = inlined_call_operand.vmem [shape: f32[4,4], index: 1, kind: input, shape index: {}]   ;;  %s175_s0 = inlined_call_operand.vmem [shape: f32[8,4], index: 0, kind: input, shape index: {}]   ;;  %s176_s2 = inlined_call_operand.vmem [shape: f32[1,4], index: 2, kind: input, shape index: {}]   ;;  %s177_s3 = inlined_call_operand.vmem [shape: f32[8,4], index: 3, kind: output, shape index: {}]  }
   0x1   :  { %125 = vmatprep.subr.mxu0 %v136_v0  ;;  %v15_v1 = vld [vmem:[%s174_s1] sm:$0xf]  ;;  %127 = vmatprep.mubr.msk.f32.mxu0 %vm137_vm2, %v136_v0 }
   0x2   :  { %v14_v2 = vld [vmem:[%s175_s0] sm:$0xff]  ;;  %126 = vmatpush3.msk.msra.mxu0 %vm27_vm0, %v15_v1 }
   0x3   :  { %128 = vmatmul.mubr.msk.f32.vlgmr.msra.gmra.mrb[0].mxu0 %vm23_vm1, %v14_v2  ;;  %v120_v3 = vld [vmem:[%s176_s2] ss:$0 sm:$0xff] }
  0xd6   :  { %v97_v4 = vpop.f32.mrb[0].mxu0 }
  0xd7   :  { %v98_v5 = vadd.f32 %v120_v3, %v97_v4  ;;  %v129_v6 = vpop.f32.mrb[1].mxu0 }
  0xd9   :  { %v101_v7 = vsel %vm23_vm1, %v98_v5, -inf }
  0xda   :  { %102 = vmax.xlane.f32.xlu0 %v101_v7 }
 0x167   :  { %v103_v8 = vpop.xlane.xlu0 %102 }
 0x168   :  { %v104_v9 = vsub.f32 %v98_v5, %v103_v8 }
 0x16a   :  { %v105_v10 = vmul.f32 1.442695, %v104_v9 }
 0x16c   :  { %132 = vpow2.f32 %v105_v10 }
 0x176   :  { %v133_v11 = vpop.eup %132 }
 0x177   :  { %v107_v12 = vsel %vm23_vm1, %v133_v11, 0.0 }
 0x178   :  { %108 = vadd.xlane.f32.xlu0 %v107_v12 }
 0x205   :  { %v109_v13 = vpop.xlane.xlu0 %108 }
 0x206   :  { %134 = vrcp.f32 %v109_v13 }
 0x210   :  { %v135_v14 = vpop.eup %134 }
 0x211   :  { %v111_v15 = vmul.f32 %v135_v14, %v109_v13 }
 0x213   :  { %v112_v16 = vsub.f32 2.0, %v111_v15 }
 0x215   :  { %v113_v17 = vmul.f32 %v135_v14, %v112_v16 }
 0x217   :  { %v114_v18 = vmul.f32 %v133_v11, %v113_v17 }
 0x219   :  { %115 = vst.msk [vmem:[%s177_s3] sm:$0xff] %vm23_vm1, %v114_v18 }

</bundles_post_ra>
